<compile_context>
chip_gen: v5e
topology: v5e:2x2
jax: 0.10.0
libtpu: 0.0.40
codegen_flags: <defaults>
</compile_context>

<pallas_src>
import jax
import jax.numpy as jnp
from jax.experimental import pallas as pl
from jax.experimental.pallas import tpu as pltpu


def _round_up(x, m):
    return ((x + m - 1) // m) * m


def _spatial_attention_kernel(
    sf_ref,        # (TB, P, D)  spatial features tile (compute dtype)
    dec_ref,       # (TB, H)     decoder hidden states (compute dtype)
    wv_ref,        # (D, A_pad)  visual2att weight, (in, out) layout (compute dtype)
    wh_ref,        # (H, A_pad)  hidden2att weight (compute dtype)
    b_ref,         # (1, A_pad)  bv + bh, folded bias (f32)
    wa_ref,        # (1, A_pad)  att2weight weight as a row vector (f32)
    out_feat_ref,  # (TB, D)     attention-weighted spatial feature (f32)
    out_w_ref,     # (TB, P)     attention weights (f32)
):
    tb, p, d = sf_ref.shape
    a = wv_ref.shape[1]

    sf = sf_ref[...]                                     # (TB, P, D)

    # visual_att: one big (TB*P, D) @ (D, A) MXU matmul with f32 accumulation.
    # (Leading-dim collapse is layout-preserving when P % 8 == 0.)
    visual = jnp.dot(sf.reshape(tb * p, d), wv_ref[...],
                     preferred_element_type=jnp.float32).reshape(tb, p, a)

    # hidden_att: (TB, H) @ (H, A) + (bv + bh), broadcast over the pixel axis.
    hidden = jnp.dot(dec_ref[...], wh_ref[...],
                     preferred_element_type=jnp.float32) + b_ref[...]

    # tanh(visual_att + hidden_att) in f32 (EUP).
    t = jnp.tanh(visual + hidden[:, None, :])            # (TB, P, A_pad)

    # Attention logits, lane-dense along P: contract A (lane axis) with the
    # att2weight row vector via VPU multiply + XLU lane reduce.  The att2weight
    # bias is a constant shift of every logit and cancels in the softmax.
    alpha = jnp.sum(t * wa_ref[...][None], axis=-1)      # (TB, P) f32

    # Softmax over the pixel (last / lane) axis.
    m = jnp.max(alpha, axis=-1, keepdims=True)
    e = jnp.exp(alpha - m)
    denom = jnp.sum(e, axis=-1, keepdims=True)
    w = e * pl.reciprocal(denom, approx=False)           # (TB, P) f32

    out_w_ref[...] = w

    # Attention-weighted feature sum on VPU/XLU in f32 (avoids TB separate
    # M=1 MXU matmuls that pay MRF push/drain latency on v5e/v6e).
    out_feat_ref[...] = jnp.sum(sf.astype(jnp.float32) * w[:, :, None], axis=1)


def spatial_attention(spatial_features, decoder_out, params, *,
                      batch_tile=None, compute_dtype=jnp.bfloat16,
                      vmem_budget_bytes=32 * 1024 * 1024):
    """Fused Spatial_Attention forward.

    params: PyTorch-Linear-shaped weights (out, in) and biases (out,).
    compute_dtype: dtype fed to the MXU matmuls (bf16 default); biases, tanh,
                   softmax and accumulation stay f32.
    """
    B, P, D = spatial_features.shape
    H = decoder_out.shape[1]
    A = params["wv"].shape[0]
    A_pad = _round_up(A, 128)            # lane-dense attention dim

    isz = jnp.dtype(compute_dtype).itemsize

    # --- derive the batch tile from a VMEM working-set budget ----------------
    # Per-batch-row bytes: double-buffered input/output tiles + f32 activation
    # intermediates (visual/tanh and the f32 weighted-sum temporary).
    per_row = (2 * (P * D + H) * isz         # sf / dec tiles (x2 pipeline bufs)
               + 2 * (D + P) * 4             # out_feat / out_w tiles (x2 bufs)
               + P * (2 * A_pad + D) * 4)    # f32 intermediates
    weight_bytes = 2 * ((D + H) * A_pad * isz + 2 * A_pad * 4)

    tb_cap = max(8, ((vmem_budget_bytes - weight_bytes) // per_row) // 8 * 8)
    tb_cap = min(tb_cap, 1024)

    b_ceil8 = _round_up(B, 8)
    if batch_tile is not None:
        tb = max(8, _round_up(int(batch_tile), 8))
    elif b_ceil8 <= tb_cap:
        # Whole batch fits in one tile; split once so a 2-TensorCore chip (v7x)
        # can shard the "parallel" batch axis across both cores.
        tb = b_ceil8 if b_ceil8 <= 8 else max(8, (b_ceil8 // 2) // 8 * 8)
    else:
        tb = tb_cap
    b_pad = _round_up(B, tb)
    grid = (b_pad // tb,)

    # --- inputs: single cast, pad only on the ragged-batch path --------------
    sf_c = jnp.asarray(spatial_features).astype(compute_dtype)
    dec_c = jnp.asarray(decoder_out).astype(compute_dtype)
    if b_pad != B:
        sf_c = jnp.pad(sf_c, ((0, b_pad - B), (0, 0), (0, 0)))
        dec_c = jnp.pad(dec_c, ((0, b_pad - B), (0, 0)))

    # --- weights: (in, out) layout, bv folded into bh, ba dropped, A padded ---
    wv = jnp.asarray(params["wv"], jnp.float32).T                 # (D, A)
    wh = jnp.asarray(params["wh"], jnp.float32).T                 # (H, A)
    bias = (jnp.asarray(params["bv"], jnp.float32)
            + jnp.asarray(params["bh"], jnp.float32)).reshape(1, A)
    wa = jnp.asarray(params["wa"], jnp.float32).reshape(1, A)
    if A_pad != A:
        pad = ((0, 0), (0, A_pad - A))
        wv, wh, bias, wa = (jnp.pad(x, pad) for x in (wv, wh, bias, wa))
    wv = wv.astype(compute_dtype)
    wh = wh.astype(compute_dtype)

    # Explicit scoped-VMEM limit (safe on all generations; v7x physical = 64 MiB).
    vmem_limit = max(int(tb * per_row + weight_bytes) + (4 << 20), 16 << 20)

    out_shapes = (
        jax.ShapeDtypeStruct((b_pad, D), jnp.float32),   # weighted spatial feature
        jax.ShapeDtypeStruct((b_pad, P), jnp.float32),   # attention weights
    )

    feat, w = pl.pallas_call(
        _spatial_attention_kernel,
        out_shape=out_shapes,
        grid=grid,
        in_specs=[
            pl.BlockSpec((tb, P, D), lambda b: (b, 0, 0)),   # spatial features tile
            pl.BlockSpec((tb, H), lambda b: (b, 0)),         # decoder hidden tile
            pl.BlockSpec((D, A_pad), lambda b: (0, 0)),      # Wv (grid-invariant)
            pl.BlockSpec((H, A_pad), lambda b: (0, 0)),      # Wh (grid-invariant)
            pl.BlockSpec((1, A_pad), lambda b: (0, 0)),      # bv + bh
            pl.BlockSpec((1, A_pad), lambda b: (0, 0)),      # wa row vector
        ],
        out_specs=(
            pl.BlockSpec((tb, D), lambda b: (b, 0)),
            pl.BlockSpec((tb, P), lambda b: (b, 0)),
        ),
        compiler_params=pltpu.CompilerParams(
            dimension_semantics=("parallel",),
            vmem_limit_bytes=vmem_limit),
    )(sf_c, dec_c, wv, wh, bias, wa)

    if b_pad != B:
        feat = feat[:B]
        w = w[:B]
    return feat, w


def spatial_attention_ref(spatial_features, decoder_out, params):
    """Pure-JAX reference mirroring the PyTorch forward exactly (f32)."""
    visual_att = spatial_features @ params["wv"].T + params["bv"]          # (B,P,A)
    hidden_att = decoder_out @ params["wh"].T + params["bh"]               # (B,A)
    att_alpha = (jnp.tanh(visual_att + hidden_att[:, None, :]) @ params["wa"].T
                 + params["ba"])[..., 0]                                   # (B,P)
    att_weights = jax.nn.softmax(att_alpha, axis=1)
    weighted = jnp.sum(spatial_features * att_weights[..., None], axis=1)
    return weighted, att_weights


if __name__ == "__main__":
    image_dim, hidden_dim, att_dim = 32, 32, 64
    P = 16
    B = 16

    key = jax.random.PRNGKey(0)
    k_sf, k_dec, k1, k2, k3, k4, k5, k6 = jax.random.split(key, 8)

    def linear_init(kw, kb, out_dim, in_dim):
        bound = 1.0 / (in_dim ** 0.5)
        w = jax.random.uniform(kw, (out_dim, in_dim), jnp.float32, -bound, bound)
        b = jax.random.uniform(kb, (out_dim,), jnp.float32, -bound, bound)
        return w, b

    wv, bv = linear_init(k1, k2, att_dim, image_dim)      # visual2att
    wh, bh = linear_init(k3, k4, att_dim, hidden_dim)     # hidden2att
    wa, ba = linear_init(k5, k6, 1, att_dim)              # att2weight
    params = dict(wv=wv, bv=bv, wh=wh, bh=bh, wa=wa, ba=ba)

    sf = jax.random.normal(k_sf, (B, P, image_dim), jnp.float32)
    dec = jax.random.normal(k_dec, (B, hidden_dim), jnp.float32)

    ref_feat, ref_w = spatial_attention_ref(sf, dec, params)

    # f32 MXU path, aligned batch (grid length 2): tight tolerance.
    feat, w = spatial_attention(sf, dec, params, compute_dtype=jnp.float32)
    jax.block_until_ready((feat, w))
    assert feat.shape == (B, image_dim) and w.shape == (B, P)
    assert jnp.allclose(feat, ref_feat, atol=2e-5, rtol=2e-5), "feature mismatch (f32)"
    assert jnp.allclose(w, ref_w, atol=2e-5, rtol=2e-5), "weight mismatch (f32)"

    # Ragged batch (B=3 -> one padded 8-row tile), f32 path.
    feat_r, w_r = spatial_attention(sf[:3], dec[:3], params,
                                    compute_dtype=jnp.float32)
    jax.block_until_ready((feat_r, w_r))
    assert jnp.allclose(feat_r, ref_feat[:3], atol=2e-5, rtol=2e-5), "feature mismatch (ragged)"
    assert jnp.allclose(w_r, ref_w[:3], atol=2e-5, rtol=2e-5), "weight mismatch (ragged)"

    # Default bf16 MXU path (perf path); bias/tanh/softmax/accumulation stay f32.
    feat_b, w_b = spatial_attention(sf, dec, params)
    jax.block_until_ready((feat_b, w_b))
    assert jnp.allclose(feat_b, ref_feat, atol=5e-2, rtol=5e-2), "feature mismatch (bf16)"
    assert jnp.allclose(w_b, ref_w, atol=5e-2, rtol=5e-2), "weight mismatch (bf16)"

    # Explicit batch_tile override still works (single-step grid).
    feat_t, w_t = spatial_attention(sf, dec, params, batch_tile=16,
                                    compute_dtype=jnp.float32)
    jax.block_until_ready((feat_t, w_t))
    assert jnp.allclose(feat_t, ref_feat, atol=2e-5, rtol=2e-5), "feature mismatch (tile=16)"

    print("KERNEL_OK")
</pallas_src>

<mosaic_0001>
module attributes {stable_mosaic.version = 11 : i64} {
  func.func @_spatial_attention_kernel(%arg0: i32, %arg1: memref<8x16x32xf32, #tpu.memory_space<vmem>>, %arg2: memref<8x32xf32, #tpu.memory_space<vmem>>, %arg3: memref<32x128xf32, #tpu.memory_space<vmem>>, %arg4: memref<32x128xf32, #tpu.memory_space<vmem>>, %arg5: memref<1x128xf32, #tpu.memory_space<vmem>>, %arg6: memref<1x128xf32, #tpu.memory_space<vmem>>, %arg7: memref<8x32xf32, #tpu.memory_space<vmem>>, %arg8: memref<8x16xf32, #tpu.memory_space<vmem>>) attributes {dimension_semantics = [#tpu.dimension_semantics<parallel>], iteration_bounds = array<i64: 2>, scalar_prefetch = 0 : i64, scratch_operands = 0 : i64, tpu.core_type = #tpu.core_type<tc>, window_params = [{transform_indices = @transform_0, window_bounds = array<i64: 8, 16, 32>}, {transform_indices = @transform_1, window_bounds = array<i64: 8, 32>}, {pipeline_mode = #tpu.pipeline_mode<synchronous>, transform_indices = @transform_2, window_bounds = array<i64: 32, 128>}, {pipeline_mode = #tpu.pipeline_mode<synchronous>, transform_indices = @transform_3, window_bounds = array<i64: 32, 128>}, {pipeline_mode = #tpu.pipeline_mode<synchronous>, transform_indices = @transform_4, window_bounds = array<i64: 1, 128>}, {pipeline_mode = #tpu.pipeline_mode<synchronous>, transform_indices = @transform_5, window_bounds = array<i64: 1, 128>}, {transform_indices = @transform_6, window_bounds = array<i64: 8, 32>}, {transform_indices = @transform_7, window_bounds = array<i64: 8, 16>}]} {
    %c0 = arith.constant 0 : index
    %c0_0 = arith.constant 0 : index
    %c0_1 = arith.constant 0 : index
    %0 = vector.load %arg1[%c0, %c0_0, %c0_1] : memref<8x16x32xf32, #tpu.memory_space<vmem>>, vector<8x16x32xf32>
    %1 = vector.shape_cast %0 : vector<8x16x32xf32> to vector<128x32xf32>
    %c0_2 = arith.constant 0 : index
    %c0_3 = arith.constant 0 : index
    %2 = vector.load %arg3[%c0_2, %c0_3] : memref<32x128xf32, #tpu.memory_space<vmem>>, vector<32x128xf32>
    %cst = arith.constant dense<0.000000e+00> : vector<128x128xf32>
    %3 = tpu.matmul %1, %2, %cst {dimension_numbers = #tpu.dot_dimension_numbers<[1], [0], [0], [1], [0, 0, 1, 1], [], []>} : vector<128x32xf32>, vector<32x128xf32>, vector<128x128xf32> -> vector<128x128xf32>
    %4 = vector.shape_cast %3 : vector<128x128xf32> to vector<8x16x128xf32>
    %c0_4 = arith.constant 0 : index
    %c0_5 = arith.constant 0 : index
    %5 = vector.load %arg2[%c0_4, %c0_5] : memref<8x32xf32, #tpu.memory_space<vmem>>, vector<8x32xf32>
    %c0_6 = arith.constant 0 : index
    %c0_7 = arith.constant 0 : index
    %6 = vector.load %arg4[%c0_6, %c0_7] : memref<32x128xf32, #tpu.memory_space<vmem>>, vector<32x128xf32>
    %cst_8 = arith.constant dense<0.000000e+00> : vector<8x128xf32>
    %7 = tpu.matmul %5, %6, %cst_8 {dimension_numbers = #tpu.dot_dimension_numbers<[1], [0], [0], [1], [0, 0, 1, 1], [], []>} : vector<8x32xf32>, vector<32x128xf32>, vector<8x128xf32> -> vector<8x128xf32>
    %c0_9 = arith.constant 0 : index
    %c0_10 = arith.constant 0 : index
    %8 = vector.load %arg5[%c0_9, %c0_10] : memref<1x128xf32, #tpu.memory_space<vmem>>, vector<1x128xf32>
    %9 = vector.broadcast %8 : vector<1x128xf32> to vector<8x128xf32>
    %10 = arith.addf %7, %9 : vector<8x128xf32>
    %11 = vector.shape_cast %10 : vector<8x128xf32> to vector<8x1x128xf32>
    %12 = vector.broadcast %11 : vector<8x1x128xf32> to vector<8x16x128xf32>
    %13 = arith.addf %4, %12 : vector<8x16x128xf32>
    %14 = math.tanh %13 : vector<8x16x128xf32>
    %c0_11 = arith.constant 0 : index
    %c0_12 = arith.constant 0 : index
    %15 = vector.load %arg6[%c0_11, %c0_12] : memref<1x128xf32, #tpu.memory_space<vmem>>, vector<1x128xf32>
    %16 = vector.shape_cast %15 : vector<1x128xf32> to vector<1x1x128xf32>
    %17 = vector.broadcast %16 : vector<1x1x128xf32> to vector<8x16x128xf32>
    %18 = arith.mulf %14, %17 : vector<8x16x128xf32>
    %cst_13 = arith.constant dense<0.000000e+00> : vector<8x16xf32>
    %19 = vector.multi_reduction <add>, %18, %cst_13 [2] : vector<8x16x128xf32> to vector<8x16xf32>
    %cst_14 = arith.constant dense<0xFF800000> : vector<8xf32>
    %20 = vector.multi_reduction <maximumf>, %19, %cst_14 [1] : vector<8x16xf32> to vector<8xf32>
    %21 = vector.shape_cast %20 : vector<8xf32> to vector<8x1xf32>
    %22 = vector.broadcast %21 : vector<8x1xf32> to vector<8x16xf32>
    %23 = arith.subf %19, %22 : vector<8x16xf32>
    %24 = math.exp %23 : vector<8x16xf32>
    %cst_15 = arith.constant dense<0.000000e+00> : vector<8xf32>
    %25 = vector.multi_reduction <add>, %24, %cst_15 [1] : vector<8x16xf32> to vector<8xf32>
    %26 = vector.shape_cast %25 : vector<8xf32> to vector<8x1xf32>
    %27 = tpu.reciprocal %26 : vector<8x1xf32> -> vector<8x1xf32>
    %28 = vector.broadcast %27 : vector<8x1xf32> to vector<8x16xf32>
    %29 = arith.mulf %24, %28 : vector<8x16xf32>
    %c0_16 = arith.constant 0 : index
    %c0_17 = arith.constant 0 : index
    %30 = vector.load %arg8[%c0_16, %c0_17] : memref<8x16xf32, #tpu.memory_space<vmem>>, vector<8x16xf32>
    tpu.vector_store %arg8[%c0_16, %c0_17], %29 {strides = array<i32>} : memref<8x16xf32, #tpu.memory_space<vmem>>, vector<8x16xf32>,
    %31 = vector.shape_cast %29 : vector<8x16xf32> to vector<8x16x1xf32>
    %32 = vector.broadcast %31 : vector<8x16x1xf32> to vector<8x16x32xf32>
    %33 = arith.mulf %0, %32 : vector<8x16x32xf32>
    %cst_18 = arith.constant dense<0.000000e+00> : vector<8x32xf32>
    %34 = vector.multi_reduction <add>, %33, %cst_18 [1] : vector<8x16x32xf32> to vector<8x32xf32>
    %c0_19 = arith.constant 0 : index
    %c0_20 = arith.constant 0 : index
    %35 = vector.load %arg7[%c0_19, %c0_20] : memref<8x32xf32, #tpu.memory_space<vmem>>, vector<8x32xf32>
    tpu.vector_store %arg7[%c0_19, %c0_20], %34 {strides = array<i32>} : memref<8x32xf32, #tpu.memory_space<vmem>>, vector<8x32xf32>,
    return
  }
  func.func @transform_0(%arg0: i32) -> (i32, i32, i32) {
    %c0_i32 = arith.constant 0 : i32
    %c0_i32_0 = arith.constant 0 : i32
    %c0_i32_1 = arith.constant 0 : i32
    return %arg0, %c0_i32, %c0_i32_0 : i32, i32, i32
  }
  func.func @transform_1(%arg0: i32) -> (i32, i32) {
    %c0_i32 = arith.constant 0 : i32
    %c0_i32_0 = arith.constant 0 : i32
    return %arg0, %c0_i32 : i32, i32
  }
  func.func @transform_2(%arg0: i32) -> (i32, i32) {
    %c0_i32 = arith.constant 0 : i32
    %c0_i32_0 = arith.constant 0 : i32
    %c0_i32_1 = arith.constant 0 : i32
    return %c0_i32, %c0_i32_0 : i32, i32
  }
  func.func @transform_3(%arg0: i32) -> (i32, i32) {
    %c0_i32 = arith.constant 0 : i32
    %c0_i32_0 = arith.constant 0 : i32
    %c0_i32_1 = arith.constant 0 : i32
    return %c0_i32, %c0_i32_0 : i32, i32
  }
  func.func @transform_4(%arg0: i32) -> (i32, i32) {
    %c0_i32 = arith.constant 0 : i32
    %c0_i32_0 = arith.constant 0 : i32
    %c0_i32_1 = arith.constant 0 : i32
    return %c0_i32, %c0_i32_0 : i32, i32
  }
  func.func @transform_5(%arg0: i32) -> (i32, i32) {
    %c0_i32 = arith.constant 0 : i32
    %c0_i32_0 = arith.constant 0 : i32
    %c0_i32_1 = arith.constant 0 : i32
    return %c0_i32, %c0_i32_0 : i32, i32
  }
  func.func @transform_6(%arg0: i32) -> (i32, i32) {
    %c0_i32 = arith.constant 0 : i32
    %c0_i32_0 = arith.constant 0 : i32
    return %arg0, %c0_i32 : i32, i32
  }
  func.func @transform_7(%arg0: i32) -> (i32, i32) {
    %c0_i32 = arith.constant 0 : i32
    %c0_i32_0 = arith.constant 0 : i32
    return %arg0, %c0_i32 : i32, i32
  }
}

</mosaic_0001>

<bundles_post_ra>
// kernel: tpu_custom_call.1
= control target key start
LH: loop header
LB: loop body
LE: loop exit
PB: predicated region body
PF: predicated region fallthrough
CT: control target
= control target key end

     0   :  { %s2467_s0 = inlined_call_operand.hbm [shape: f32[16,16,32], index: 0, kind: input, shape index: {}]   ;;  %s2468_s1 = inlined_call_operand.hbm [shape: f32[16,32], index: 1, kind: input, shape index: {}]   ;;  %s2469_s2 = inlined_call_operand.hbm [shape: f32[32,128], index: 2, kind: input, shape index: {}]   ;;  %s2470_s3 = inlined_call_operand.hbm [shape: f32[32,128], index: 3, kind: input, shape index: {}]   ;;  %s2471_s4 = inlined_call_operand.vmem [shape: f32[1,128], index: 4, kind: input, shape index: {}]   ;;  %s2472_s5 = inlined_call_operand.vmem [shape: f32[1,128], index: 5, kind: input, shape index: {}]   ;;  %s2473_s6 = inlined_call_operand.hbm [shape: f32[16,32], index: 6, kind: output, shape index: {0}]   ;;  %s2474_s7 = inlined_call_operand.hbm [shape: f32[16,16], index: 7, kind: output, shape index: {1}]  }
   0x1   :  { %2481 = sst [smem:[#allocation23_spill]] %s2469_s2 }
   0x2   :  { %2482 = sst [smem:[#allocation24_spill]] %s2470_s3 }
   0x3   :  { %13 = vsyncpa [#allocation3], 0 }
   0x4   :  { %15 = vsyncpa [#allocation3 + $0x1], 0 }
   0x5   :  { %16 = vsyncpa [#allocation6], 0 }
   0x6   :  { %18 = vsyncpa [#allocation6 + $0x1], 0 }
   0x7   :  { %19 = vsyncpa [#allocation9], 0 }
   0x8   :  { %20 = vsyncpa [#allocation4], 0 }
   0x9   :  { %22 = vsyncpa [#allocation4 + $0x1], 0 }
   0xa   :  { %23 = vsyncpa [#allocation12], 0 }
   0xb   :  { %25 = vsyncpa [#allocation12 + $0x1], 0  ;;  %s1813_s24 = smov 0   ;;  %s1815_s25 = smov 0  }
   0xc   :  { %s1817_s26 = smov 0   ;;  %s1819_s27 = smov 0  }
   0xd LB: > { %2483 = sst [smem:[#allocation19_spill]] %s1762_s26  ;;  %s1834_s28 = sadd.s32 4294967295, %s1766_s27   ;;  %s1766_s27 = sphi %s1819_s27, %s2498_s27   ;;  %s1762_s26 = sphi %s1817_s26, %s2500_s26   ;;  %s1758_s25 = sphi %s1815_s25, %s2502_s25   ;;  %s1754_s24 = sphi %s1813_s24, %s2501_s24  }
   0xe   : > { %s1330_s29 = sadd.s32 4294967294, %s1766_s27   ;;  %p51_p0 = scmp.ne.s32.totalorder %s1758_s25, %s1754_s24 }
   0xf   : > { %p52_p1 = scmp.eq.s32.totalorder %s1834_s28, 0  ;;  %p185_p2 = scmp.eq.s32.totalorder %s1834_s28, 1 }
  0x10   : > { %p191_p3 = scmp.eq.s32.totalorder %s1330_s29, 1  ;;  %p1331_p5 = scmp.ge.s32.totalorder %s1766_s27, 1 }
  0x11   : > { %p1843_p4 = por %p52_p1, %p51_p0  ;;  %p224_p7 = scmp.lt.s32.totalorder %s1766_s27, 3 }
  0x12   : > { %p1848_p6 = por %p191_p3, %p51_p0  ;;  %s2487_s2 = sld [smem:[#allocation23_spill]] }
  0x13   : > { %p1856_p8 = pnand %p1331_p5, %p224_p7  ;;  %s1768_s13 = smov [#allocation7]  }
  0x14   : > { %s2485_s8 = scalar_select %p1848_p6, 1, 0 }
  0x15   : > { %p1401_p9 = pneg %p1856_p8  ;;  %s237_s14 = sshll.u32 %s1768_s13, 4  ;;  %s238_s14 = int_to_ptr.vmem [resolvable:$true] %s237_s14 }
  0x16   : > { %2486 = sst [smem:[#allocation20_spill]] %s2485_s8  ;;  %s2475_s18 = smov 128  }
  0x17   : > { %p1402_p10 = pnand %p1401_p9, %p52_p1  ;;  %s2489_s3 = sld [smem:[#allocation24_spill]] }
  0x18   : > { %s235_s11 = sshll.u32 %s2487_s2, 4  ;;  %s2476_s19 = smov 8   ;;  %s236_s11 = int_to_ptr.hbm [resolvable:$true] %s235_s11 }
  0x19   : > { %1404 = dma.hbm_to_vmem [thread:$0]  (!%p1402_p10), %s236_s11, 512, %s238_s14, [#allocation6], %s2475_s18, %s2475_s18, %s2476_s19  }
  0x1a   : > { %s1771_s20 = smov [#allocation8]   ;;  %s1875_s22 = sadd.s32 1, %s1766_s27  }
  0x1b   : > { %s251_s21 = sshll.u32 %s1771_s20, 4  ;;  %2490 = sst [smem:[#allocation21_spill]] %s1875_s22  ;;  %s252_s21 = int_to_ptr.vmem [resolvable:$true] %s251_s21 }
  0x1c   : > { %s38_s23 = sadd.s32 1, %s1762_s26  ;;  %s35_s29 = ssub.s32 %s1766_s27, %s1875_s22 }
  0x1d   : > { %s249_s17 = sshll.u32 %s2489_s3, 4  ;;  %p45_p12 = scmp.ne.s32.totalorder %s1762_s26, %s1758_s25  ;;  %s250_s17 = int_to_ptr.hbm [resolvable:$true] %s249_s17 }
  0x1e   : > { %1407 = dma.hbm_to_vmem [thread:$0]  (!%p1402_p10), %s250_s17, 512, %s252_s21, [#allocation9], %s2475_s18, %s2475_s18, %s2476_s19  }
  0x1f   : > { %p36_p13 = scmp.eq.s32.totalorder %s35_s29, 0  ;;  %p46_p0 = scmp.eq.s32.totalorder %s1766_s27, 0 }
  0x20   : > { %p1885_p3 = por %p185_p2, %p45_p12  ;;  %p1424_p5 = scmp.lt.s32.totalorder %s1766_s27, 2 }
  0x21   : > { %s1891_s10 = scalar_select %p36_p13, %s1762_s26, %s38_s23  }
  0x22   : > { %p47_p7 = por %p46_p0, %p45_p12  ;;  %s1894_s11 = sand.u32 1, %s1762_s26  }
  0x23   : > { %2492 = sst [smem:[#allocation22_spill]] %s1891_s10  ;;  %s1335_s13 = sshll.u32 %s1894_s11, 7 }
  0x24   : > { %s1372_s14 = sshll.u32 %s1766_s27, 7  ;;  %s275_s20 = scalar_lea.vmem [#allocation2], %s1335_s13 }
  0x25   : > { %s281_s17 = scalar_lea.hbm %s2467_s0, %s1372_s14  ;;  %s284_s21 = sshll.u32 %s275_s20, 4  ;;  %s285_s21 = int_to_ptr.vmem [resolvable:$true] %s284_s21 }
  0x26   : > { %s282_s29 = sshll.u32 %s281_s17, 4  ;;  %p1901_p2 = pnand %p1424_p5, %p47_p7  ;;  %s283_s29 = int_to_ptr.hbm [resolvable:$true] %s282_s29 }
  0x27   : > { %s294_s18 = sand.u32 1, %s1766_s27   ;;  %s1339_s19 = sshll.u32 %s1894_s11, 3 }
  0x28   : > { %s272_s2 = scalar_lea.sflag [#allocation3], %s1894_s11  ;;  %s1596_s3 = sshra.s32 %s283_s29, 4  ;;  %s1597_s3 = int_to_ptr.hbm [resolvable:$true] %s1596_s3 }
  0x29   : > { %s1598_s10 = scalar_lea.hbm %s1597_s3, 128  ;;  %p1600_p10 = pneg %p1901_p2 }
  0x2a   : > { %p1599_p9 = scmp.ne.s32.totalorder %s1597_s3, %s1598_s10  ;;  %s1603_s15 = scalar_lea.hbm %s2467_s0, 256 }
  0x2b   : > { %p1604_p0 = scmp.lt.s32.totalorder %s1597_s3, %s2467_s0  ;;  %p1605_p5 = scmp.lt.s32.totalorder %s1603_s15, %s1598_s10 }
  0x2c   : > { %p1601_p12 = pnand %p1600_p10, %p1599_p9 }
  0x2d   : > { %p1606_p7 = por %p1605_p5, %p1604_p0 }
  0x2e   : > { %p1602_p13 = pneg %p1601_p12 }
  0x30   : > { %p1607_p11 = pnand %p1606_p7, %p1602_p13 }
  0x32   : > { %1610 = shalt.err (!%p1607_p11)
}
  0x33   : > { %s2494_s11 = smov 8   ;;  %s2495_s20 = smov 128  }
  0x34   : > { %1411 = dma.hbm_to_vmem [thread:$0]  (!%p1901_p2), %s283_s29, 2048, %s285_s21, %s272_s2, %s2495_s20, %s2495_s20, %s2494_s11  }
  0x35   : > { %s1340_s26 = sshll.u32 %s1766_s27, 3  ;;  %s298_s8 = scalar_lea.vmem [#allocation5], %s1339_s19 }
  0x36   : > { %s302_s14 = scalar_lea.hbm %s2468_s1, %s1340_s26  ;;  %s306_s16 = sshll.u32 %s298_s8, 4  ;;  %s307_s16 = int_to_ptr.vmem [resolvable:$true] %s306_s16 }
  0x37   : > { %s304_s3 = sshll.u32 %s302_s14, 4  ;;  %s295_s10 = scalar_lea.sflag [#allocation6], %s294_s18  ;;  %s305_s3 = int_to_ptr.hbm [resolvable:$true] %s304_s3 }
  0x38   : > { %s1626_s15 = sshra.s32 %s305_s3, 4  ;;  %s1633_s29 = scalar_lea.hbm %s2468_s1, 16  ;;  %s1627_s15 = int_to_ptr.hbm [resolvable:$true] %s1626_s15 }
  0x39   : > { %s1628_s17 = scalar_lea.hbm %s1627_s15, 8  ;;  %p1634_p13 = scmp.lt.s32.totalorder %s1627_s15, %s2468_s1 }
  0x3a   : > { %p1629_p11 = scmp.ne.s32.totalorder %s1627_s15, %s1628_s17  ;;  %p1635_p0 = scmp.lt.s32.totalorder %s1633_s29, %s1628_s17 }
  0x3c   : > { %p1631_p9 = pnand %p1629_p11, %p1600_p10  ;;  %p1636_p5 = por %p1635_p0, %p1634_p13 }
  0x3e   : > { %p1632_p12 = pneg %p1631_p9 }
  0x40   : > { %p1637_p7 = pnand %p1636_p5, %p1632_p12 }
  0x42   : > { %1640 = shalt.err (!%p1637_p7)
}
  0x43   : > { %1414 = dma.hbm_to_vmem [thread:$0]  (!%p1901_p2), %s305_s3, 128, %s307_s16, %s295_s10  }
  0x44   : > { %315 = sbr.rel (%p1856_p8) target bundleno = 1021 (0x3fd), region = 44  ;;  %s1942_s8 = sand.u32 (!%p1856_p8), 1, %s1758_s25  }
  0x45   : > { %s1342_s18 = sshll.u32 (!%p1856_p8), %s1942_s8, 7  ;;  %s318_s19 = scalar_lea.sflag (!%p1856_p8), [#allocation3], %s1942_s8 }
  0x46   : > { %s1946_s11 = scalar_lea.vmem (!%p1856_p8), [#allocation2], %s1342_s18 }
  0x49   : > { %1729 = dma.done.wait (%p1843_p4), %s318_s19, 2048  }
  0x4a   : > { %1731 = vsyncadd (%p1843_p4), %s318_s19, 4294965248  ;;  %s327_s12 = sand.u32 1, %s1834_s28   ;;  %s1954_s23 = sshll.u32 %s1942_s8, 3 }
  0x4b   : > { %s328_s20 = scalar_lea.sflag [#allocation6], %s327_s12  ;;  %s331_s13 = scalar_lea.vmem [#allocation5], %s1954_s23 }
  0x4c   : > { %1733 = dma.done.wait (%p1843_p4), %s328_s20, 128  }
  0x4d   : > { %1735 = vsyncadd (%p1843_p4), %s328_s20, 4294967168 }
  0x4e   : > { %1737 = dma.done.wait (%p52_p1), [#allocation6], 512  }
  0x4f   : > { %1739 = vsyncadd (%p52_p1), [#allocation6], 4294966784 }
  0x50   : > { %1741 = dma.done.wait (%p52_p1), [#allocation9], 512  }
  0x51   : > { %1743 = vsyncadd (%p52_p1), [#allocation9], 4294966784  ;;  %v403_v0 = vld [vmem:[#allocation7 + $0x18] sm:$0xff]  ;;  %v402_v1 = vld [vmem:[#allocation7 + $0x10] sm:$0xff]  ;;  %vm404_vm0 = vcmask 261120   ;;  %vm679_vm1 = vcmask 130112  }
  0x52   : > { %465 = vmatpush.msra.mxu0 %v403_v0  ;;  %1373 = vmatpush.msra.mxu1 %v403_v0  ;;  %v401_v2 = vld [vmem:[#allocation7 + $0x8] sm:$0xff]  ;;  %v400_v3 = vld [vmem:[#allocation7] sm:$0xff]  ;;  %v1970_v4 = vld [vmem:[%s1946_s11] sm:$0xff]  ;;  %vm702_vm2 = vcmask 1041409   ;;  %vm704_vm3 = vcmask 1042434   ;;  %vm706_vm4 = vcmask 1043459  }
  0x53   : > { %1374 = vmatpush.msra.mxu2 %v403_v0  ;;  %1375 = vmatpush.msra.mxu3 %v403_v0  ;;  %v1973_v5 = vld [vmem:[%s1946_s11 + $0x20] sm:$0xff]  ;;  %v1976_v6 = vld [vmem:[%s1946_s11 + $0x30] sm:$0xff]  ;;  %v1979_v7 = vld [vmem:[%s1946_s11 + $0x58] sm:$0xff]  ;;  %vm708_vm5 = vcmask 1044484   ;;  %vm710_vm6 = vcmask 1045509   ;;  %vm712_vm7 = vcmask 1046534  }
  0x54   : > { %466 = vmatpush.msra.mxu0 %v402_v1  ;;  %1376 = vmatpush.msra.mxu1 %v402_v1  ;;  %v522_v8 = vld [vmem:[#allocation8 + $0x18] sm:$0xff]  ;;  %v521_v9 = vld [vmem:[#allocation8 + $0x10] sm:$0xff]  ;;  %v520_v10 = vld [vmem:[#allocation8 + $0x8] sm:$0xff]  ;;  %vm714_vm8 = vcmask 1047559   ;;  %vm717_vm9 = vcmask 130048   ;;  %s1367_s10 = sshll.u32 %s1834_s28, 3 }
  0x55   : > { %1377 = vmatpush.msra.mxu2 %v402_v1  ;;  %1378 = vmatpush.msra.mxu3 %v402_v1  ;;  %v1990_v11 = vld [vmem:[%s1946_s11 + $0x8] sm:$0xff]  ;;  %v1996_v13 = vld [vmem:[%s1946_s11 + $0x38] sm:$0xff]  ;;  %v1999_v14 = vld [vmem:[%s1946_s11 + $0x60] sm:$0xff]  ;;  %s2387_s2 = scalar_lea.hbm %s2474_s7, %s1367_s10  ;;  %s382_s21 = scalar_lea.vmem [#allocation11], %s1954_s23 }
  0x56   : > { %467 = vmatpush.msra.mxu0 %v401_v2  ;;  %1379 = vmatpush.msra.mxu1 %v401_v2  ;;  %v1993_v12 = vld [vmem:[%s1946_s11 + $0x28] sm:$0xff]  ;;  %v519_v15 = vld [vmem:[#allocation8] sm:$0xff]  ;;  %v2015_v18 = vld [vmem:[%s1946_s11 + $0x40] sm:$0xff]  ;;  %s2397_s29 = sshll.u32 %s382_s21, 4  ;;  %s1184_s22 = sshll.u32 %s2387_s2, 4  ;;  %s1183_s29 = int_to_ptr.vmem [resolvable:$true] %s2397_s29  ;;  %s1185_s22 = int_to_ptr.hbm [resolvable:$true] %s1184_s22 }
  0x57   : > { %1380 = vmatpush.msra.mxu2 %v401_v2  ;;  %1381 = vmatpush.msra.mxu3 %v401_v2  ;;  %v2010_v16 = vld [vmem:[%s1946_s11 + $0x10] sm:$0xff]  ;;  %v518_v17 = vld [vmem:[%s331_s13] sm:$0xff]  ;;  %v2028_v20 = vld [vmem:[%s1946_s11 + $0x18] sm:$0xff]  ;;  %s1156_s26 = scalar_lea.sflag [#allocation12], %s1942_s8  ;;  %s1670_s18 = sshra.s32 %s1185_s22, 4  ;;  %s1671_s18 = int_to_ptr.hbm [resolvable:$true] %s1670_s18 }
  0x58   : > { %468 = vmatpush.msra.mxu0 %v400_v3  ;;  %1382 = vmatpush.msra.mxu1 %v400_v3  ;;  %v2018_v19 = vld [vmem:[%s1946_s11 + $0x68] sm:$0xff]  ;;  %v2034_v22 = vld [vmem:[%s1946_s11 + $0x70] sm:$0xff]  ;;  %v2046_v24 = vld [vmem:[%s1946_s11 + $0x78] sm:$0xff]  ;;  %s1672_s19 = scalar_lea.hbm %s1671_s18, 8  ;;  %s1676_s20 = scalar_lea.hbm %s2474_s7, 16 }
  0x59   : > { %1383 = vmatpush.msra.mxu2 %v400_v3  ;;  %1384 = vmatpush.msra.mxu3 %v400_v3  ;;  %v2031_v21 = vld [vmem:[%s1946_s11 + $0x48] sm:$0xff]  ;;  %v2043_v23 = vld [vmem:[%s1946_s11 + $0x50] sm:$0xff]  ;;  %v1468_v30 = vld [vmem:[%s2471_s4] ss:$0 sm:$0xff]  ;;  %p1673_p1 = scmp.ne.s32.totalorder %s1671_s18, %s1672_s19  ;;  %p1677_p2 = scmp.lt.s32.totalorder %s1671_s18, %s2474_s7 }
  0x5a   : > { %1348 = vmatmul.msk.f32.vlgmr.msra.gmra.mxu0 %vm404_vm0, %v1970_v4  ;;  %1352 = vmatmul.msk.f32.vlgmr.msra.gmra.mxu1 %vm404_vm0, %v1973_v5  ;;  %v2066_v47 = vld [vmem:[%s2472_s5] ss:$0 sm:$0xff]  ;;  %p1678_p10 = scmp.lt.s32.totalorder %s1676_s20, %s1672_s19 }
  0x5b   : > { %1354 = vmatmul.msk.f32.vlgmr.msra.gmra.mxu2 %vm404_vm0, %v1976_v6  ;;  %1359 = vmatmul.msk.f32.vlgmr.msra.gmra.mxu3 %vm404_vm0, %v1979_v7  ;;  %p1674_p4 = pnand %p1673_p1, %p1885_p3 }
  0x5c   : > { %542 = vmatpush.msrb.mxu1 %v522_v8  ;;  %p1679_p11 = por %p1678_p10, %p1677_p2 }
  0x5d   : > { %p1675_p8 = pneg %p1674_p4 }
  0x5e   : > { %543 = vmatpush.msrb.mxu1 %v521_v9 }
  0x5f   : > { %p1680_p9 = pnand %p1679_p11, %p1675_p8 }
  0x60   : > { %544 = vmatpush.msrb.mxu1 %v520_v10 }
  0x62   : > { %1349 = vmatmul.msk.f32.gmra.mxu0 %vm404_vm0, %v1990_v11  ;;  %1353 = vmatmul.msk.f32.gmra.mxu1 %vm404_vm0, %v1993_v12 }
  0x63   : > { %1355 = vmatmul.msk.f32.gmra.mxu2 %vm404_vm0, %v1996_v13  ;;  %1360 = vmatmul.msk.f32.gmra.mxu3 %vm404_vm0, %v1999_v14 }
  0x64   : > { %545 = vmatpush.msrb.mxu1 %v519_v15 }
  0x6a   : > { %1350 = vmatmul.msk.f32.gmra.mxu0 %vm404_vm0, %v2010_v16  ;;  %1364 = vmatmul.msk.f32.vlgmr.msrb.gmra.mxu1 %vm404_vm0, %v518_v17 }
  0x6b   : > { %1356 = vmatmul.msk.f32.gmra.mxu2 %vm404_vm0, %v2015_v18  ;;  %1361 = vmatmul.msk.f32.gmra.mxu3 %vm404_vm0, %v2018_v19 }
  0x72   : > { %1351 = vmatmul.msk.f32.gmra.mxu0 %vm404_vm0, %v2028_v20 }
  0x73   : > { %1357 = vmatmul.msk.f32.gmra.mxu2 %vm404_vm0, %v2031_v21  ;;  %1362 = vmatmul.msk.f32.gmra.mxu3 %vm404_vm0, %v2034_v22 }
  0x7b   : > { %1358 = vmatmul.msk.f32.gmra.mxu2 %vm404_vm0, %v2043_v23  ;;  %1363 = vmatmul.msk.f32.gmra.mxu3 %vm404_vm0, %v2046_v24 }
  0xd7   : > { %v482_v25 = vpop.f32.mrf.mxu1  ;;  %v470_v26 = vpop.f32.mrf.mxu0 }
  0xde   : > { %v488_v27 = vpop.f32.mrf.mxu2  ;;  %v2055_v31 = vpop.f32.mrf.mxu3 }
  0xdf   : > { %v485_v28 = vpop.f32.mrf.mxu1  ;;  %v473_v29 = vpop.f32.mrf.mxu0 }
  0xe6   : > { %v491_v32 = vpop.f32.mrf.mxu2  ;;  %v506_v45 = vpop.f32.mrf.mxu3 }
  0xe7   : > { %v547_v33 = vpop.f32.mrf.mxu1  ;;  %v476_v41 = vpop.f32.mrf.mxu0 }
  0xe8   : > { %v2057_v34 = vadd.f32 %v1468_v30, %v547_v33 }
  0xea   : > { %v551_v35 = vrot.slane %v2057_v34, 1  ;;  %v558_v36 = vperm.slane %v2057_v34, 0  ;;  %v552_v37 = vrot.slane %v2057_v34, 2  ;;  %v553_v44 = vrot.slane %v2057_v34, 3 }
  0xeb   : > { %v554_v53 = vrot.slane %v2057_v34, 4  ;;  %v556_v57 = vrot.slane %v2057_v34, 6  ;;  %v555_v10 = vrot.slane %v2057_v34, 5 }
  0xec   : > { %v559_v38 = vperm.slane %v551_v35, 0  ;;  %v574_v39 = vadd.f32 %v558_v36, %v470_v26  ;;  %v560_v40 = vperm.slane %v552_v37, 0  ;;  %v575_v48 = vadd.f32 %v558_v36, %v473_v29 }
  0xed   : > { %v561_v49 = vperm.slane %v553_v44, 0  ;;  %v562_v63 = vperm.slane %v554_v53, 0  ;;  %v564_v2 = vperm.slane %v556_v57, 0  ;;  %v563_v29 = vperm.slane %v555_v10, 0 }
  0xee   : > { %v494_v42 = vpop.f32.mrf.mxu2  ;;  %v576_v43 = vadd.f32 %v559_v38, %v476_v41  ;;  %1470 = vtanh.f32 %v574_v39  ;;  %v578_v46 = vadd.f32 %v560_v40, %v482_v25  ;;  %v579_v52 = vadd.f32 %v560_v40, %v485_v28  ;;  %v509_v59 = vpop.f32.mrf.mxu3 }
  0xef   : > { %v581_v54 = vadd.f32 %v561_v49, %v491_v32  ;;  %v580_v58 = vadd.f32 %v561_v49, %v488_v27  ;;  %v479_v60 = vpop.f32.mrf.mxu0  ;;  %v582_v9 = vadd.f32 %v562_v63, %v494_v42  ;;  %v586_v25 = vadd.f32 %v564_v2, %v506_v45 }
  0xf0   : > { %1472 = vtanh.f32 %v576_v43  ;;  %v577_v3 = vadd.f32 %v559_v38, %v479_v60  ;;  %v585_v37 = vadd.f32 %v563_v29, %v2055_v31  ;;  %v557_v40 = vrot.slane %v2057_v34, 7 }
  0xf1   : > { %1474 = vtanh.f32 %v578_v46  ;;  %v587_v44 = vadd.f32 %v564_v2, %v509_v59 }
  0xf2   : > { %1476 = vtanh.f32 %v575_v48  ;;  %v565_v45 = vperm.slane %v557_v40, 0 }
  0xf3   : > { %1478 = vtanh.f32 %v579_v52 }
  0xf4   : > { %v1471_v50 = vpop.eup %1470  ;;  %1480 = vtanh.f32 %v581_v54 }
  0xf5   : > { %v610_v51 = vmul.f32 %v1471_v50, %v2066_v47  ;;  %1482 = vtanh.f32 %v580_v58 }
  0xf6   : > { %v497_v55 = vpop.f32.mrf.mxu2  ;;  %v1473_v56 = vpop.eup %1472  ;;  %1484 = vtanh.f32 %v577_v3  ;;  %v674_v3 = vlaneseq }
  0xf7   : > { %626 = vadd.xlane.f32.xlu0 %v610_v51  ;;  %v612_v61 = vmul.f32 %v1473_v56, %v2066_v47  ;;  %v1475_v62 = vpop.eup %1474  ;;  %1486 = vtanh.f32 %v582_v9  ;;  %v512_v30 = vpop.f32.mrf.mxu3  ;;  %v583_v39 = vadd.f32 %v562_v63, %v497_v55 }
  0xf8   : > { %v614_v0 = vmul.f32 %v1475_v62, %v2066_v47  ;;  %v1477_v1 = vpop.eup %1476  ;;  %1488 = vtanh.f32 %v586_v25  ;;  %v588_v49 = vadd.f32 %v565_v45, %v512_v30  ;;  %v2103_v9 = vand.u32 127, %v674_v3 }
  0xf9   : > { %630 = vadd.xlane.f32.xlu1 %v612_v61  ;;  %v611_v8 = vmul.f32 %v1477_v1, %v2066_v47  ;;  %v1479_v15 = vpop.eup %1478 }
  0xfa   : > { %634 = vadd.xlane.f32.xlu2 %v614_v0  ;;  %v1481_v17 = vpop.eup %1480  ;;  %v615_v32 = vmul.f32 %v1479_v15, %v2066_v47 }
  0xfb   : > { %v617_v27 = vmul.f32 %v1481_v17, %v2066_v47  ;;  %v1483_v28 = vpop.eup %1482 }
  0xfc   : > { %v616_v35 = vmul.f32 %v1483_v28, %v2066_v47  ;;  %v1485_v36 = vpop.eup %1484 }
  0xfd   : > { %v1487_v38 = vpop.eup %1486  ;;  %v613_v41 = vmul.f32 %v1485_v36, %v2066_v47 }
  0xfe   : > { %v500_v26 = vpop.f32.mrf.mxu2  ;;  %v1489_v42 = vpop.eup %1488  ;;  %v618_v43 = vmul.f32 %v1487_v38, %v2066_v47 }
  0xff   : > { %628 = vadd.xlane.f32.xlu0 %v611_v8  ;;  %v584_v33 = vadd.f32 %v563_v29, %v500_v26  ;;  %v515_v46 = vpop.f32.mrf.mxu3  ;;  %v622_v31 = vmul.f32 %v1489_v42, %v2066_v47 }
 0x100   : > { %v589_v34 = vadd.f32 %v565_v45, %v515_v46 }
 0x101   : > { %640 = vadd.xlane.f32.xlu1 %v617_v27  ;;  %1490 = vtanh.f32 %v584_v33 }
 0x102   : > { %636 = vadd.xlane.f32.xlu2 %v615_v32  ;;  %1492 = vtanh.f32 %v585_v37 }
 0x103   : > { %1494 = vtanh.f32 %v583_v39 }
 0x104   : > { %1496 = vtanh.f32 %v587_v44 }
 0x105   : > { %1498 = vtanh.f32 %v588_v49 }
 0x106   : > { %1500 = vtanh.f32 %v589_v34 }
 0x107   : > { %638 = vadd.xlane.f32.xlu0 %v616_v35  ;;  %v1491_v48 = vpop.eup %1490 }
 0x108   : > { %v1493_v50 = vpop.eup %1492  ;;  %v620_v51 = vmul.f32 %v1491_v48, %v2066_v47 }
 0x109   : > { %632 = vadd.xlane.f32.xlu1 %v613_v41  ;;  %v1495_v52 = vpop.eup %1494  ;;  %v621_v53 = vmul.f32 %v1493_v50, %v2066_v47 }
 0x10a   : > { %642 = vadd.xlane.f32.xlu2 %v618_v43  ;;  %v619_v54 = vmul.f32 %v1495_v52, %v2066_v47  ;;  %v1497_v55 = vpop.eup %1496 }
 0x10b   : > { %v1499_v56 = vpop.eup %1498  ;;  %v623_v57 = vmul.f32 %v1497_v55, %v2066_v47 }
 0x10c   : > { %v1501_v58 = vpop.eup %1500  ;;  %v624_v59 = vmul.f32 %v1499_v56, %v2066_v47 }
 0x10d   : > { %v625_v60 = vmul.f32 %v1501_v58, %v2066_v47  ;;  %v2108_v47 = vadd.s32 4294967288, %v2103_v9 }
 0x10f   : > { %650 = vadd.xlane.f32.xlu0 %v622_v31 }
 0x111   : > { %646 = vadd.xlane.f32.xlu1 %v620_v51 }
 0x112   : > { %648 = vadd.xlane.f32.xlu2 %v621_v53 }
 0x117   : > { %644 = vadd.xlane.f32.xlu0 %v619_v54 }
 0x119   : > { %652 = vadd.xlane.f32.xlu1 %v623_v57 }
 0x11a   : > { %654 = vadd.xlane.f32.xlu2 %v624_v59 }
 0x11f   : > { %656 = vadd.xlane.f32.xlu0 %v625_v60 }
 0x16a   : > { %v2089_v61 = vpop.xlane.xlu0 %626 }
 0x16b   : > { %v676_v28 = vperm.slane %v2089_v61, %v2103_v9 }
 0x16c   : > { %v2091_v62 = vpop.xlane.xlu1 %630 }
 0x16d   : > { %v2093_v63 = vpop.xlane.xlu2 %634  ;;  %v681_v26 = vperm.slane %v2091_v62, %v2103_v9 }
 0x16e   : > { %v684_v35 = vperm.slane %v2093_v63, %v2103_v9 }
 0x172   : > { %v2095_v0 = vpop.xlane.xlu0 %628 }
 0x173   : > { %v678_v27 = vperm.slane %v2095_v0, %v2108_v47 }
 0x174   : > { %v2097_v1 = vpop.xlane.xlu1 %640 }
 0x175   : > { %v2099_v2 = vpop.xlane.xlu2 %636  ;;  %v680_v33 = vsel %vm679_vm1, %v678_v27, %v676_v28  ;;  %v688_v41 = vperm.slane %v2097_v1, %v2108_v47  ;;  %v1772_v27 = vmov 0  }
 0x176   : > { %v685_v30 = vperm.slane %v2099_v2, %v2108_v47  ;;  %1467 = vset.pattern.permute.xlu1 %v1772_v27  ;;  %1466 = vset.pattern.permute.xlu0 %v1772_v27 }
 0x177   : > { %1465 = vset.pattern.permute.xlu2 %v1772_v27 }
 0x178   : > { %v686_v39 = vsel %vm679_vm1, %v685_v30, %v684_v35 }
 0x17a   : > { %v2101_v8 = vpop.xlane.xlu0 %638 }
 0x17b   : > { %v687_v38 = vperm.slane %v2101_v8, %v2103_v9 }
 0x17c   : > { %v2105_v10 = vpop.xlane.xlu1 %632 }
 0x17d   : > { %v2110_v15 = vpop.xlane.xlu2 %642  ;;  %v682_v17 = vperm.slane %v2105_v10, %v2108_v47  ;;  %v689_v45 = vsel %vm679_vm1, %v688_v41, %v687_v38 }
 0x17e   : > { %v690_v42 = vperm.slane %v2110_v15, %v2103_v9 }
 0x17f   : > { %v683_v29 = vsel %vm679_vm1, %v682_v17, %v681_v26 }
 0x180   : > { %v703_v36 = vsel %vm702_vm2, %v683_v29, %v680_v33 }
 0x181   : > { %v705_v43 = vsel %vm704_vm3, %v686_v39, %v703_v36 }
 0x182   : > { %v2114_v25 = vpop.xlane.xlu0 %650  ;;  %v707_v50 = vsel %vm706_vm4, %v689_v45, %v705_v43 }
 0x183   : > { %v696_v52 = vperm.slane %v2114_v25, %v2103_v9 }
 0x184   : > { %v2125_v32 = vpop.xlane.xlu1 %646 }
 0x185   : > { %v2131_v37 = vpop.xlane.xlu2 %648  ;;  %v693_v31 = vperm.slane %v2125_v32, %v2103_v9 }
 0x186   : > { %v694_v46 = vperm.slane %v2131_v37, %v2108_v47 }
 0x188   : > { %v695_v54 = vsel %vm679_vm1, %v694_v46, %v693_v31 }
 0x18a   : > { %v2136_v40 = vpop.xlane.xlu0 %644 }
 0x18b   : > { %v691_v44 = vperm.slane %v2136_v40, %v2108_v47 }
 0x18c   : > { %v2151_v49 = vpop.xlane.xlu1 %652 }
 0x18d   : > { %v692_v48 = vsel %vm679_vm1, %v691_v44, %v690_v42  ;;  %v697_v34 = vperm.slane %v2151_v49, %v2108_v47  ;;  %v2159_v53 = vpop.xlane.xlu2 %654 }
 0x18e   : > { %v709_v51 = vsel %vm708_vm5, %v692_v48, %v707_v50  ;;  %v699_v58 = vperm.slane %v2159_v53, %v2103_v9 }
 0x18f   : > { %v698_v56 = vsel %vm679_vm1, %v697_v34, %v696_v52  ;;  %v711_v57 = vsel %vm710_vm6, %v695_v54, %v709_v51 }
 0x190   : > { %v713_v3 = vsel %vm712_vm7, %v698_v56, %v711_v57 }
 0x192   : > { %v2162_v55 = vpop.xlane.xlu0 %656 }
 0x193   : > { %v700_v59 = vperm.slane %v2162_v55, %v2108_v47 }
 0x195   : > { %v701_v60 = vsel %vm679_vm1, %v700_v59, %v699_v58 }
 0x196   : > { %v715_v17 = vsel %vm714_vm8, %v701_v60, %v713_v3 }
 0x197   : > { %v718_v26 = vsel %vm717_vm9, %v715_v17, -inf }
 0x198   : > { %719 = vmax.xlane.f32.xlu1 %v718_v26 }
 0x20b   : > { %v2174_v28 = vpop.xlane.xlu1 %719 }
 0x20c   : > { %v723_v29 = vperm.slane %v2174_v28, 1  ;;  %v722_v30 = vperm.slane %v2174_v28, 0  ;;  %v724_v38 = vperm.slane %v2174_v28, 2  ;;  %v726_v39 = vperm.slane %v2174_v28, 4 }
 0x20d   : > { %v727_v31 = vperm.slane %v2174_v28, 5  ;;  %v729_v56 = vperm.slane %v2174_v28, 7  ;;  %v728_v17 = vperm.slane %v2174_v28, 6 }
 0x20e   : > { %v740_v33 = vsub.f32 %v2091_v62, %v723_v29  ;;  %v739_v35 = vsub.f32 %v2095_v0, %v722_v30  ;;  %v738_v36 = vsub.f32 %v2089_v61, %v722_v30  ;;  %v743_v44 = vsub.f32 %v2099_v2, %v724_v38 }
 0x20f   : > { %v746_v45 = vsub.f32 %v2110_v15, %v726_v39  ;;  %v741_v62 = vsub.f32 %v2105_v10, %v723_v29  ;;  %v725_v0 = vperm.slane %v2174_v28, 3  ;;  %v749_v15 = vsub.f32 %v2131_v37, %v727_v31 }
 0x210   : > { %v758_v41 = vmul.f32 1.442695, %v740_v33  ;;  %v756_v42 = vmul.f32 1.442695, %v739_v35  ;;  %v754_v43 = vmul.f32 1.442695, %v738_v36  ;;  %v742_v51 = vsub.f32 %v2093_v63, %v724_v38 }
 0x211   : > { %v764_v46 = vmul.f32 1.442695, %v743_v44  ;;  %v770_v61 = vmul.f32 1.442695, %v746_v45  ;;  %v760_v50 = vmul.f32 1.442695, %v741_v62  ;;  %v745_v10 = vsub.f32 %v2097_v1, %v725_v0 }
 0x212   : > { %1502 = vpow2.f32 %v758_v41  ;;  %v776_v54 = vmul.f32 1.442695, %v749_v15  ;;  %v762_v58 = vmul.f32 1.442695, %v742_v51  ;;  %v748_v37 = vsub.f32 %v2125_v32, %v727_v31 }
 0x213   : > { %1504 = vpow2.f32 %v756_v42  ;;  %v768_v52 = vmul.f32 1.442695, %v745_v10  ;;  %v752_v63 = vsub.f32 %v2159_v53, %v729_v56  ;;  %v744_v60 = vsub.f32 %v2101_v8, %v725_v0 }
 0x214   : > { %1506 = vpow2.f32 %v754_v43  ;;  %v774_v3 = vmul.f32 1.442695, %v748_v37  ;;  %v751_v53 = vsub.f32 %v2151_v49, %v728_v17  ;;  %v747_v8 = vsub.f32 %v2136_v40, %v726_v39 }
 0x215   : > { %1508 = vpow2.f32 %v764_v46  ;;  %v782_v26 = vmul.f32 1.442695, %v752_v63  ;;  %v766_v29 = vmul.f32 1.442695, %v744_v60  ;;  %v750_v49 = vsub.f32 %v2114_v25, %v728_v17 }
 0x216   : > { %1510 = vpow2.f32 %v770_v61  ;;  %v780_v28 = vmul.f32 1.442695, %v751_v53  ;;  %v772_v35 = vmul.f32 1.442695, %v747_v8  ;;  %v753_v42 = vsub.f32 %v2162_v55, %v729_v56 }
 0x217   : > { %1512 = vpow2.f32 %v760_v50  ;;  %v778_v40 = vmul.f32 1.442695, %v750_v49 }
 0x218   : > { %v2188_v48 = vpop.eup %1502  ;;  %1514 = vpow2.f32 %v768_v52  ;;  %v784_v43 = vmul.f32 1.442695, %v753_v42 }
 0x219   : > { %v2190_v34 = vpop.eup %1504  ;;  %809 = vperm.xlu1 %1467, %v2188_v48   ;;  %1516 = vpow2.f32 %v776_v54 }
 0x21a   : > { %v2193_v2 = vpop.eup %1506  ;;  %806 = vperm.xlu0 %1466, %v2190_v34   ;;  %1518 = vpow2.f32 %v762_v58 }
 0x21b   : > { %803 = vperm.xlu2 %1465, %v2193_v2   ;;  %v2201_v57 = vpop.eup %1508  ;;  %1520 = vpow2.f32 %v774_v3 }
 0x21c   : > { %v2203_v59 = vpop.eup %1510  ;;  %1522 = vpow2.f32 %v782_v26 }
 0x21d   : > { %v2206_v1 = vpop.eup %1512  ;;  %1524 = vpow2.f32 %v766_v29 }
 0x21e   : > { %v2214_v27 = vpop.eup %1514  ;;  %1526 = vpow2.f32 %v780_v28 }
 0x21f   : > { %v2216_v30 = vpop.eup %1516  ;;  %1528 = vpow2.f32 %v772_v35 }
 0x220   : > { %v2219_v32 = vpop.eup %1518  ;;  %1530 = vpow2.f32 %v778_v40 }
 0x221   : > { %818 = vperm.xlu1 %1467, %v2201_v57   ;;  %v2225_v33 = vpop.eup %1520  ;;  %1532 = vpow2.f32 %v784_v43 }
 0x222   : > { %827 = vperm.xlu0 %1466, %v2203_v59   ;;  %v2227_v36 = vpop.eup %1522 }
 0x223   : > { %812 = vperm.xlu2 %1465, %v2206_v1   ;;  %v2230_v38 = vpop.eup %1524 }
 0x224   : > { %v2235_v41 = vpop.eup %1526 }
 0x225   : > { %v2238_v39 = vpop.eup %1528 }
 0x226   : > { %v2242_v44 = vpop.eup %1530 }
 0x227   : > { %v2245_v45 = vpop.eup %1532 }
 0x229   : > { %824 = vperm.xlu1 %1467, %v2214_v27  }
 0x22a   : > { %836 = vperm.xlu0 %1466, %v2216_v30  }
 0x22b   : > { %815 = vperm.xlu2 %1465, %v2219_v32  }
 0x231   : > { %833 = vperm.xlu1 %1467, %v2225_v33  }
 0x232   : > { %845 = vperm.xlu0 %1466, %v2227_v36  }
 0x233   : > { %821 = vperm.xlu2 %1465, %v2230_v38  }
 0x239   : > { %842 = vperm.xlu1 %1467, %v2235_v41  }
 0x23b   : > { %830 = vperm.xlu2 %1465, %v2238_v39  }
 0x243   : > { %839 = vperm.xlu2 %1465, %v2242_v44  }
 0x24b   : > { %848 = vperm.xlu2 %1465, %v2245_v45  }
 0x275   : > { %v804_v25 = vpop.permute.xlu2 %803 }
 0x276   : > { %v850_v37 = vperm.slane %v804_v25, %v2103_v9 }
 0x27d   : > { %v813_v62 = vpop.permute.xlu2 %812 }
 0x27e   : > { %v854_v63 = vperm.slane %v813_v62, %v2108_v47 }
 0x285   : > { %v816_v46 = vpop.permute.xlu2 %815 }
 0x286   : > { %v856_v17 = vperm.slane %v816_v46, %v2103_v9 }
 0x28b   : > { %v810_v0 = vpop.permute.xlu1 %809 }
 0x28c   : > { %v807_v61 = vpop.permute.xlu0 %806  ;;  %v853_v54 = vperm.slane %v810_v0, %v2103_v9 }
 0x28d   : > { %v822_v31 = vpop.permute.xlu2 %821  ;;  %v851_v56 = vperm.slane %v807_v61, %v2108_v47 }
 0x28e   : > { %v855_v26 = vsel %vm679_vm1, %v854_v63, %v853_v54  ;;  %v859_v53 = vperm.slane %v822_v31, %v2103_v9 }
 0x28f   : > { %v852_v29 = vsel %vm679_vm1, %v851_v56, %v850_v37 }
 0x290   : > { %v874_v49 = vsel %vm702_vm2, %v855_v26, %v852_v29 }
 0x293   : > { %v819_v50 = vpop.permute.xlu1 %818 }
 0x294   : > { %v828_v10 = vpop.permute.xlu0 %827  ;;  %v857_v58 = vperm.slane %v819_v50, %v2108_v47 }
 0x295   : > { %v831_v15 = vpop.permute.xlu2 %830  ;;  %v862_v40 = vperm.slane %v828_v10, %v2103_v9 }
 0x296   : > { %v858_v8 = vsel %vm679_vm1, %v857_v58, %v856_v17  ;;  %v863_v42 = vperm.slane %v831_v15, %v2108_v47 }
 0x297   : > { %v875_v62 = vsel %vm704_vm3, %v858_v8, %v874_v49 }
 0x298   : > { %v864_v54 = vsel %vm679_vm1, %v863_v42, %v862_v40 }
 0x29b   : > { %v825_v55 = vpop.permute.xlu1 %824 }
 0x29c   : > { %v837_v51 = vpop.permute.xlu0 %836  ;;  %v860_v60 = vperm.slane %v825_v55, %v2108_v47 }
 0x29d   : > { %v840_v52 = vpop.permute.xlu2 %839  ;;  %v866_v46 = vperm.slane %v837_v51, %v2108_v47 }
 0x29e   : > { %v861_v28 = vsel %vm679_vm1, %v860_v60, %v859_v53  ;;  %v868_v10 = vperm.slane %v840_v52, %v2103_v9 }
 0x29f   : > { %v876_v0 = vsel %vm706_vm4, %v861_v28, %v875_v62 }
 0x2a0   : > { %v877_v56 = vsel %vm708_vm5, %v864_v54, %v876_v0 }
 0x2a3   : > { %v834_v3 = vpop.permute.xlu1 %833 }
 0x2a4   : > { %v865_v35 = vperm.slane %v834_v3, %v2103_v9  ;;  %v846_v43 = vpop.permute.xlu0 %845 }
 0x2a5   : > { %v849_v25 = vpop.permute.xlu2 %848  ;;  %v871_v31 = vperm.slane %v846_v43, %v2103_v9 }
 0x2a6   : > { %v867_v61 = vsel %vm679_vm1, %v866_v46, %v865_v35  ;;  %v872_v50 = vperm.slane %v849_v25, %v2108_v47 }
 0x2a7   : > { %v878_v51 = vsel %vm710_vm6, %v867_v61, %v877_v56 }
 0x2a8   : > { %v873_v37 = vsel %vm679_vm1, %v872_v50, %v871_v31 }
 0x2ab   : > { %v843_v55 = vpop.permute.xlu1 %842 }
 0x2ac   : > { %v869_v15 = vperm.slane %v843_v55, %v2108_v47 }
 0x2ae   : > { %v870_v58 = vsel %vm679_vm1, %v869_v15, %v868_v10 }
 0x2af   : > { %v879_v63 = vsel %vm712_vm7, %v870_v58, %v878_v51 }
 0x2b0   : > { %v880_v60 = vsel %vm714_vm8, %v873_v37, %v879_v63 }
 0x2b1   : > { %v882_v3 = vsel %vm717_vm9, %v880_v60, 0.0 }
 0x2b2   : > { %883 = vadd.xlane.f32.xlu1 %v882_v3 }
 0x325   : > { %v884_v17 = vpop.xlane.xlu1 %883 }
 0x326   : > { %1534 = vrcp.f32 %v884_v17  ;;  %v896_v53 = vand.u32 2147483648, %v884_v17  ;;  %v894_v28 = vand.u32 2147483647, %v884_v17  ;;  %vm890_vm11 = vweird.f32 %v884_v17 }
 0x328   : > { %v897_v49 = vor.u32 1.1754944e-38, %v896_v53  ;;  %vm895_vm13 = vcmp.eq.f32.partialorder %v894_v28, 8.507059e+37 }
 0x32c   : > { %v1535_v52 = vpop.eup %1534 }
 0x32d   : > { %v886_v26 = vmul.f32 %v1535_v52, %v884_v17  ;;  %vm891_vm10 = vweird.f32 %v1535_v52 }
 0x32e   : > { %vm892_vm12 = vmor %vm890_vm11, %vm891_vm10 }
 0x32f   : > { %v887_v29 = vsub.f32 1.0, %v886_v26 }
 0x331   : > { %v888_v8 = vmul.f32 %v1535_v52, %v887_v29 }
 0x333   : > { %v889_v35 = vadd.f32 %v1535_v52, %v888_v8 }
 0x335   : > { %v893_v40 = vsel %vm892_vm12, %v1535_v52, %v889_v35 }
 0x336   : > { %v898_v42 = vsel %vm895_vm13, %v897_v49, %v893_v40 }
 0x337   : > { %v905_v43 = vperm.slane %v898_v42, 5  ;;  %v900_v25 = vperm.slane %v898_v42, 0  ;;  %v901_v61 = vperm.slane %v898_v42, 1  ;;  %v902_v55 = vperm.slane %v898_v42, 2 }
 0x338   : > { %v904_v15 = vperm.slane %v898_v42, 4  ;;  %v906_v56 = vperm.slane %v898_v42, 6  ;;  %v907_v58 = vperm.slane %v898_v42, 7 }
 0x339   : > { %v926_v62 = vmul.f32 %v2225_v33, %v905_v43  ;;  %v917_v46 = vmul.f32 %v2190_v34, %v900_v25  ;;  %v916_v0 = vmul.f32 %v2193_v2, %v900_v25  ;;  %v919_v31 = vmul.f32 %v2206_v1, %v901_v61 }
 0x33a   : > { %v918_v50 = vmul.f32 %v2188_v48, %v901_v61  ;;  %v921_v54 = vmul.f32 %v2201_v57, %v902_v55  ;;  %v920_v10 = vmul.f32 %v2219_v32, %v902_v55  ;;  %v903_v34 = vperm.slane %v898_v42, 3 }
 0x33b   : > { %979 = vperm.xlu1 %1467, %v926_v62   ;;  %952 = vperm.xlu2 %1465, %v917_v46   ;;  %v925_v1 = vmul.f32 %v2238_v39, %v904_v15  ;;  %v924_v48 = vmul.f32 %v2203_v59, %v904_v15  ;;  %v928_v57 = vmul.f32 %v2242_v44, %v906_v56 }
 0x33c   : > { %949 = vperm.xlu0 %1466, %v916_v0   ;;  %v923_v2 = vmul.f32 %v2214_v27, %v903_v34  ;;  %v922_v33 = vmul.f32 %v2230_v38, %v903_v34  ;;  %v927_v32 = vmul.f32 %v2216_v30, %v905_v43  ;;  %v930_v27 = vmul.f32 %v2227_v36, %v907_v58 }
 0x33d   : > { %v929_v38 = vmul.f32 %v2235_v41, %v906_v56  ;;  %v931_v39 = vmul.f32 %v2245_v45, %v907_v58 }
 0x343   : > { %958 = vperm.xlu2 %1465, %v919_v31  }
 0x344   : > { %955 = vperm.xlu0 %1466, %v918_v50  }
 0x34b   : > { %964 = vperm.xlu2 %1465, %v921_v54  }
 0x34c   : > { %961 = vperm.xlu0 %1466, %v920_v10  }
 0x353   : > { %970 = vperm.xlu2 %1465, %v923_v2  }
 0x354   : > { %967 = vperm.xlu0 %1466, %v922_v33  }
 0x35b   : > { %976 = vperm.xlu2 %1465, %v925_v1  }
 0x35c   : > { %973 = vperm.xlu0 %1466, %v924_v48  }
 0x363   : > { %985 = vperm.xlu2 %1465, %v928_v57  }
 0x364   : > { %982 = vperm.xlu0 %1466, %v927_v32  }
 0x36b   : > { %991 = vperm.xlu2 %1465, %v930_v27  }
 0x36c   : > { %988 = vperm.xlu0 %1466, %v929_v38  }
 0x374   : > { %994 = vperm.xlu0 %1466, %v931_v39  }
 0x395   : > { %v953_v59 = vpop.permute.xlu2 %952 }
 0x396   : > { %v1046_v41 = vmul.f32 %v953_v59, %v1990_v11  ;;  %v997_v1 = vperm.slane %v953_v59, %v2108_v47 }
 0x398   : > { %v1062_v53 = vsel %vm404_vm0, %v1046_v41, 0.0 }
 0x39d   : > { %v959_v37 = vpop.permute.xlu2 %958 }
 0x39e   : > { %v1048_v26 = vmul.f32 %v959_v37, %v2028_v20  ;;  %v1000_v48 = vperm.slane %v959_v37, %v2108_v47 }
 0x3a5   : > { %v2296_v60 = vpop.permute.xlu2 %964 }
 0x3a6   : > { %v1050_v35 = vmul.f32 %v2296_v60, %v1993_v12  ;;  %v1003_v57 = vperm.slane %v2296_v60, %v2108_v47 }
 0x3a8   : > { %v1080_v62 = vsel %vm404_vm0, %v1050_v35, 0.0 }
 0x3ad   : > { %v2300_v30 = vpop.permute.xlu2 %970  ;;  %v2322_v49 = vpop.permute.xlu1 %979 }
 0x3ae   : > { %v950_v51 = vpop.permute.xlu0 %949  ;;  %v1052_v40 = vmul.f32 %v2300_v30, %v1996_v13  ;;  %v1055_v25 = vmul.f32 %v2322_v49, %v2043_v23  ;;  %v1011_v32 = vperm.slane %v2322_v49, %v2103_v9  ;;  %v1006_v38 = vperm.slane %v2300_v30, %v2108_v47 }
 0x3af   : > { %v1045_v36 = vmul.f32 %v950_v51, %v1970_v4  ;;  %v996_v33 = vperm.slane %v950_v51, %v2103_v9 }
 0x3b0   : > { %v1089_v13 = vsel %vm404_vm0, %v1052_v40, 0.0  ;;  %v1106_v54 = vsel %vm404_vm0, %v1055_v25, 0.0 }
 0x3b1   : > { %v1061_v45 = vsel %vm404_vm0, %v1045_v36, 0.0  ;;  %v998_v37 = vsel %vm679_vm1, %v997_v1, %v996_v33 }
 0x3b2   : > { %v1063_v8 = vadd.f32 %v1062_v53, %v1061_v45 }
 0x3b4   : > { %v1064_v43 = vrot.slane %v1063_v8, 4 }
 0x3b5   : > { %v2308_v52 = vpop.permute.xlu2 %976 }
 0x3b6   : > { %v956_v63 = vpop.permute.xlu0 %955  ;;  %v1065_v50 = vadd.f32 %v1064_v43, %v1063_v8 }
 0x3b7   : > { %v1047_v17 = vmul.f32 %v956_v63, %v2010_v16  ;;  %v1071_v16 = vsel %vm404_vm0, %v1048_v26, 0.0  ;;  %v999_v10 = vperm.slane %v956_v63, %v2103_v9  ;;  %v1009_v63 = vperm.slane %v2308_v52, %v2108_v47 }
 0x3b8   : > { %v1066_v58 = vrot.slane %v1065_v50, 2 }
 0x3b9   : > { %v1070_v28 = vsel %vm404_vm0, %v1047_v17, 0.0  ;;  %v1001_v39 = vsel %vm679_vm1, %v1000_v48, %v999_v10 }
 0x3ba   : > { %v1072_v42 = vadd.f32 %v1071_v16, %v1070_v28  ;;  %v2367_v53 = vadd.f32 %v1066_v58, %v1065_v50 }
 0x3bc   : > { %v1073_v0 = vrot.slane %v1072_v42, 4 }
 0x3bd   : > { %v2339_v61 = vpop.permute.xlu2 %985 }
 0x3be   : > { %v2298_v44 = vpop.permute.xlu0 %961  ;;  %v1074_v56 = vadd.f32 %v1073_v0, %v1072_v42  ;;  %v1057_v59 = vmul.f32 %v2339_v61, %v1999_v14  ;;  %v1020_v14 = vsel %vm702_vm2, %v1001_v39, %v998_v37 }
 0x3bf   : > { %v1049_v4 = vmul.f32 %v2298_v44, %v1973_v5  ;;  %v1054_v5 = vmul.f32 %v2308_v52, %v2031_v21  ;;  %v1002_v60 = vperm.slane %v2298_v44, %v2103_v9 }
 0x3c0   : > { %v1075_v17 = vrot.slane %v1074_v56, 2  ;;  %v1115_v44 = vsel %vm404_vm0, %v1057_v59, 0.0 }
 0x3c1   : > { %v1098_v23 = vsel %vm404_vm0, %v1054_v5, 0.0 }
 0x3c5   : > { %v992_v28 = vpop.permute.xlu2 %991 }
 0x3c6   : > { %v2302_v3 = vpop.permute.xlu0 %967  ;;  %v1059_v43 = vmul.f32 %v992_v28, %v2034_v22 }
 0x3c7   : > { %v1051_v11 = vmul.f32 %v2302_v3, %v1976_v6  ;;  %v1079_v6 = vsel %vm404_vm0, %v1049_v4, 0.0  ;;  %v1005_v30 = vperm.slane %v2302_v3, %v2103_v9 }
 0x3c8   : > { %v1081_v31 = vadd.f32 %v1080_v62, %v1079_v6  ;;  %v1017_v62 = vperm.slane %v992_v28, %v2103_v9 }
 0x3c9   : > { %v1088_v12 = vsel %vm404_vm0, %v1051_v11, 0.0  ;;  %v1007_v42 = vsel %vm679_vm1, %v1006_v38, %v1005_v30 }
 0x3ca   : > { %v1090_v55 = vadd.f32 %v1089_v13, %v1088_v12 }
 0x3cc   : > { %v1091_v27 = vrot.slane %v1090_v55, 4 }
 0x3ce   : > { %v2311_v29 = vpop.permute.xlu0 %973  ;;  %v1092_v8 = vadd.f32 %v1091_v27, %v1090_v55  ;;  %v1124_v55 = vsel %vm404_vm0, %v1059_v43, 0.0 }
 0x3cf   : > { %v1053_v20 = vmul.f32 %v2311_v29, %v2015_v18  ;;  %v1008_v52 = vperm.slane %v2311_v29, %v2103_v9  ;;  %v1014_v29 = vperm.slane %v2339_v61, %v2103_v9 }
 0x3d0   : > { %v1093_v5 = vrot.slane %v1092_v8, 2 }
 0x3d1   : > { %v1097_v46 = vsel %vm404_vm0, %v1053_v20, 0.0  ;;  %v1076_v20 = vadd.f32 %v1075_v17, %v1074_v56  ;;  %v1010_v6 = vsel %vm679_vm1, %v1009_v63, %v1008_v52 }
 0x3d2   : > { %v1099_v34 = vadd.f32 %v1098_v23, %v1097_v46 }
 0x3d4   : > { %v1100_v51 = vrot.slane %v1099_v34, 4 }
 0x3d6   : > { %v2336_v18 = vpop.permute.xlu0 %982  ;;  %v1101_v4 = vadd.f32 %v1100_v51, %v1099_v34 }
 0x3d7   : > { %v1056_v21 = vmul.f32 %v2336_v18, %v1979_v7  ;;  %v1082_v7 = vrot.slane %v1081_v31, 4  ;;  %v1012_v11 = vperm.slane %v2336_v18, %v2108_v47 }
 0x3d8   : > { %v1102_v46 = vrot.slane %v1101_v4, 2 }
 0x3d9   : > { %v1107_v2 = vsel %vm404_vm0, %v1056_v21, 0.0  ;;  %v1083_v45 = vadd.f32 %v1082_v7, %v1081_v31  ;;  %v1013_v18 = vsel %vm679_vm1, %v1012_v11, %v1011_v32  ;;  %v1068_v32 = vrot.slane %v2367_v53, 1 }
 0x3da   : > { %v1108_v15 = vadd.f32 %v1107_v2, %v1106_v54  ;;  %v1094_v54 = vadd.f32 %v1093_v5, %v1092_v8  ;;  %v1103_v2 = vadd.f32 %v1102_v46, %v1101_v4 }
 0x3db   : > { %v1084_v40 = vrot.slane %v1083_v45, 2 }
 0x3dc   : > { %v1109_v36 = vrot.slane %v1108_v15, 4  ;;  %v1095_v58 = vrot.slane %v1094_v54, 1 }
 0x3dd   : > { %v1085_v22 = vadd.f32 %v1084_v40, %v1083_v45 }
 0x3de   : > { %v989_v41 = vpop.permute.xlu0 %988  ;;  %v1110_v16 = vadd.f32 %v1109_v36, %v1108_v15 }
 0x3df   : > { %v1058_v26 = vmul.f32 %v989_v41, %v2018_v19  ;;  %v1004_v19 = vsel %vm679_vm1, %v1003_v57, %v1002_v60  ;;  %v1015_v35 = vperm.slane %v989_v41, %v2108_v47  ;;  %v1086_v7 = vrot.slane %v1085_v22, 1 }
 0x3e0   : > { %v1021_v12 = vsel %vm704_vm3, %v1004_v19, %v1020_v14  ;;  %v1111_v0 = vrot.slane %v1110_v16, 2 }
 0x3e1   : > { %v1116_v3 = vsel %vm404_vm0, %v1058_v26, 0.0  ;;  %v1022_v13 = vsel %vm706_vm4, %v1007_v42, %v1021_v12  ;;  %v1016_v61 = vsel %vm679_vm1, %v1015_v35, %v1014_v29 }
 0x3e2   : > { %v1117_v49 = vadd.f32 %v1116_v3, %v1115_v44  ;;  %v1023_v50 = vsel %vm708_vm5, %v1010_v6, %v1022_v13  ;;  %v1112_v48 = vadd.f32 %v1111_v0, %v1110_v16 }
 0x3e3   : > { %v1024_v10 = vsel %vm710_vm6, %v1013_v18, %v1023_v50 }
 0x3e4   : > { %v1118_v25 = vrot.slane %v1117_v49, 4  ;;  %v1025_v33 = vsel %vm712_vm7, %v1016_v61, %v1024_v10 }
 0x3e6   : > { %v1119_v31 = vadd.f32 %v1118_v25, %v1117_v49  ;;  %v995_v21 = vpop.permute.xlu0 %994 }
 0x3e7   : > { %v1018_v9 = vperm.slane %v995_v21, %v2108_v47  ;;  %v1060_v23 = vmul.f32 %v995_v21, %v2046_v24  ;;  %v1077_v47 = vrot.slane %v1076_v20, 1 }
 0x3e8   : > { %v1120_v34 = vrot.slane %v1119_v31, 2 }
 0x3e9   : > { %v1019_v15 = vsel %vm679_vm1, %v1018_v9, %v1017_v62  ;;  %v1125_v1 = vsel %vm404_vm0, %v1060_v23, 0.0 }
 0x3ea   : > { %v1026_v24 = vsel %vm714_vm8, %v1019_v15, %v1025_v33  ;;  %v1126_v56 = vadd.f32 %v1125_v1, %v1124_v55  ;;  %v1121_v57 = vadd.f32 %v1120_v34, %v1119_v31 }
 0x3eb   : > { %1028 = vst.msk [vmem:[%s382_s21] sm:$0xff] %vm717_vm9, %v1026_v24 }
 0x3ec   : > { %v1127_v27 = vrot.slane %v1126_v56, 4 }
 0x3ed   : > { %1683 = shalt.err (!%p1680_p9)
}
 0x3ee   : > { %1398 = dma.vmem_to_hbm [thread:$0]  (%p1885_p3), %s1183_s29, 128, %s1185_s22, %s1156_s26   ;;  %v1104_v38 = vrot.slane %v1103_v2, 1  ;;  %v1078_v39 = vadd.f32 %v1077_v47, %v1076_v20  ;;  %v1113_v59 = vrot.slane %v1112_v48, 1  ;;  %v1128_v51 = vadd.f32 %v1127_v27, %v1126_v56 }
 0x3ef   : > { %v1087_v37 = vadd.f32 %v1086_v7, %v1085_v22  ;;  %v1122_v63 = vrot.slane %v1121_v57, 1  ;;  %v1069_v60 = vadd.f32 %v1068_v32, %v2367_v53  ;;  %v1096_v36 = vadd.f32 %v1095_v58, %v1094_v54  ;;  %s1166_s3 = scalar_lea.hbm %s2473_s6, %s1367_s10  ;;  %s375_s15 = scalar_lea.vmem [#allocation10], %s1954_s23 }
 0x3f0   : > { %v1129_v41 = vrot.slane %v1128_v51, 2  ;;  %v1105_v17 = vadd.f32 %v1104_v38, %v1103_v2  ;;  %v1114_v30 = vadd.f32 %v1113_v59, %v1112_v48  ;;  %s1168_s17 = sshll.u32 %s375_s15, 4  ;;  %s1170_s2 = sshll.u32 %s1166_s3, 4  ;;  %s1169_s17 = int_to_ptr.vmem [resolvable:$true] %s1168_s17  ;;  %s1171_s2 = int_to_ptr.hbm [resolvable:$true] %s1170_s2 }
 0x3f1   : > { %v1141_v45 = vsel %vm702_vm2, %v1078_v39, %v1069_v60  ;;  %v1123_v8 = vadd.f32 %v1122_v63, %v1121_v57  ;;  %s1151_s28 = scalar_lea.sflag [#allocation4], %s1942_s8  ;;  %s1698_s10 = sshra.s32 %s1171_s2, 4  ;;  %s1699_s10 = int_to_ptr.hbm [resolvable:$true] %s1698_s10 }
 0x3f2   : > { %v1130_v26 = vadd.f32 %v1129_v41, %v1128_v51  ;;  %v1142_v14 = vsel %vm704_vm3, %v1087_v37, %v1141_v45  ;;  %s1700_s23 = scalar_lea.hbm %s1699_s10, 8  ;;  %s1704_s22 = scalar_lea.hbm %s2473_s6, 16 }
 0x3f3   : > { %v1143_v52 = vsel %vm706_vm4, %v1096_v36, %v1142_v14  ;;  %p1701_p12 = scmp.ne.s32.totalorder %s1699_s10, %s1700_s23  ;;  %p1705_p5 = scmp.lt.s32.totalorder %s1699_s10, %s2473_s6 }
 0x3f4   : > { %v1131_v44 = vrot.slane %v1130_v26, 1  ;;  %v1144_v53 = vsel %vm708_vm5, %v1105_v17, %v1143_v52  ;;  %p1706_p7 = scmp.lt.s32.totalorder %s1704_s22, %s1700_s23 }
 0x3f5   : > { %v1145_v4 = vsel %vm710_vm6, %v1114_v30, %v1144_v53  ;;  %p1702_p13 = pnand %p1701_p12, %p1885_p3 }
 0x3f6   : > { %v1132_v28 = vadd.f32 %v1131_v44, %v1130_v26  ;;  %v1146_v11 = vsel %vm712_vm7, %v1123_v8, %v1145_v4  ;;  %p1707_p1 = por %p1706_p7, %p1705_p5 }
 0x3f7   : > { %p1703_p0 = pneg %p1702_p13 }
 0x3f8   : > { %v1147_v3 = vsel %vm714_vm8, %v1132_v28, %v1146_v11 }
 0x3f9   : > { %1149 = vst.msk [vmem:[%s375_s15] sm:$0xff] %vm404_vm0, %v1147_v3  ;;  %p1708_p4 = pnand %p1707_p1, %p1703_p0 }
 0x3fb   : > { %1711 = shalt.err (!%p1708_p4)
}
 0x3fc   : > { %1397 = dma.vmem_to_hbm [thread:$0]  (%p1885_p3), %s1169_s17, 128, %s1171_s2, %s1151_s28  }
 0x3fd PF: > { %s1196_s19 = sand.u32 1, %s1754_s24   ;;  %p2497_p8 = scmp.ge.s32.totalorder %s1766_s27, 2 }
 0x3fe   : > { %s1197_s11 = scalar_lea.sflag [#allocation4], %s1196_s19 }
 0x3ff   : > { %p1416_p2 = pnand %p2497_p8, %p1848_p6 }
 0x401   : > { %p1417_p10 = pneg %p1416_p2 }
 0x403   : > { %1745 = dma.done.wait (%p1417_p10), %s1197_s11, 128  }
 0x404   : > { %1747 = vsyncadd (%p1417_p10), %s1197_s11, 4294967168  ;;  %s1207_s12 = scalar_lea.sflag [#allocation12], %s1196_s19 }
 0x405   : > { %1749 = dma.done.wait (%p1417_p10), %s1207_s12, 128  }
 0x406   : > { %1751 = vsyncadd (%p1417_p10), %s1207_s12, 4294967168  ;;  %s2498_s27 = sld [smem:[#allocation21_spill]]  ;;  %s2501_s24 = smov %s1758_s25 }
 0x407   : > { %s2499_s20 = sld [smem:[#allocation19_spill]] }
 0x408   : > { %s2500_s26 = sld [smem:[#allocation22_spill]] }
 0x40c   : > { %p28_p3 = scmp.ge.s32.totalorder %s2498_s27, 4  }
 0x40d   : > { %s2502_s25 = smov %s2499_s20 }
 0x40e   :  { %30 = sbr.rel (!%p28_p3) target bundleno = 13 (0xd), region = 127 }
 0x413   :  { %1213 = vsyncpa [#allocation3], 1 }
 0x414   :  { %1215 = vsyncpa [#allocation3 + $0x1], 1 }
 0x415   :  { %1216 = vsyncpa [#allocation6], 1 }
 0x416   :  { %1218 = vsyncpa [#allocation6 + $0x1], 1 }
 0x417   :  { %1219 = vsyncpa [#allocation9], 1 }
 0x418   :  { %1220 = vsyncpa [#allocation4], 1 }
 0x419   :  { %1222 = vsyncpa [#allocation4 + $0x1], 1 }
 0x41a   :  { %1223 = vsyncpa [#allocation12], 1 }
 0x41b   :  { %1225 = vsyncpa [#allocation12 + $0x1], 1 }

</bundles_post_ra>
